<compile_context>
chip_gen: v5e
topology: v5e:2x2
jax: 0.10.0
libtpu: 0.0.40
codegen_flags: <defaults>
</compile_context>

<pallas_src>
import functools

import jax
import jax.numpy as jnp
from jax.experimental import pallas as pl
from jax.experimental.pallas import tpu as pltpu


def _round_up(x: int, m: int) -> int:
    return ((x + m - 1) // m) * m


def _diffusion_step_kernel(a_ref, x_ref, dinv_ref, o_ref, acc_ref):
    """acc[r] += A[r,k] @ X[k]; at the last k: o[r] = deg_inv[r] * acc[r]."""
    k = pl.program_id(1)

    @pl.when(k == 0)
    def _():
        acc_ref[...] = jnp.zeros_like(acc_ref)

    # bf16 x bf16 MXU contraction, f32 accumulation.
    acc_ref[...] += jnp.dot(a_ref[...], x_ref[...],
                            preferred_element_type=jnp.float32)

    @pl.when(k == pl.num_programs(1) - 1)
    def _():
        # Exact f32 deg^-1 (precomputed in the wrapper), applied per row.
        o_ref[...] = (dinv_ref[...] * acc_ref[...]).astype(o_ref.dtype)


def _diffusion_step(a_bf16, x_bf16, deg_inv, *, tile_n, tile_k):
    """One step of X <- D^-1 A X on padded, lane-folded operands (all in HBM)."""
    n_pad, c_pad = x_bf16.shape
    grid = (n_pad // tile_n, n_pad // tile_k)
    return pl.pallas_call(
        _diffusion_step_kernel,
        out_shape=jax.ShapeDtypeStruct((n_pad, c_pad), jnp.bfloat16),
        grid_spec=pltpu.PrefetchScalarGridSpec(
            num_scalar_prefetch=0,
            grid=grid,
            in_specs=[
                pl.BlockSpec((tile_n, tile_k), lambda r, k: (r, k)),  # A tile   (bf16)
                pl.BlockSpec((tile_k, c_pad), lambda r, k: (k, 0)),   # X panel  (bf16)
                pl.BlockSpec((tile_n, 1), lambda r, k: (r, 0)),       # deg^-1   (f32)
            ],
            out_specs=pl.BlockSpec((tile_n, c_pad), lambda r, k: (r, 0)),
            scratch_shapes=[pltpu.VMEM((tile_n, c_pad), jnp.float32)],
        ),
        compiler_params=pltpu.CompilerParams(
            # Row tiles are independent within a step -> 'parallel' (v7x 2 TCs);
            # the contraction axis stays 'arbitrary'.
            dimension_semantics=("parallel", "arbitrary"),
            vmem_limit_bytes=64 * 1024 * 1024,
        ),
    )(a_bf16, x_bf16, deg_inv)


def sgp_spatial_encoder(x, edge_index, edge_weight=None, *,
                        receptive_field=2, global_attr=True,
                        add_self_loops=False,
                        tile_n=128, tile_k=128):
    """Forward pass of SGPSpatialEncoder (bidirectional=False, undirected=False)."""
    # TODO(synk): bidirectional / undirected(gcn_norm) / one_hot_encoding /
    #             dropout_adj / remove_self_loops branches are not implemented
    #             (not part of the realized default config).
    x = x.astype(jnp.float32)
    B, N, F = x.shape
    n_steps = int(receptive_field)
    assert n_steps >= 1

    # --- densify adjacency (JAX glue).  PyTorch: `col, row = edge_index;
    #     A[row, col] = w` (overwrite on duplicate edges -> use .set, not .add).
    E = edge_index.shape[1]
    w = (jnp.ones((E,), jnp.float32) if edge_weight is None
         else edge_weight.astype(jnp.float32))
    col = edge_index[0]
    row = edge_index[1]
    adj = jnp.zeros((N, N), jnp.float32).at[row, col].set(w)
    if add_self_loops:
        idx = jnp.arange(N)
        adj = adj.at[idx, idx].set(1.0)

    # Exact f32 row degrees; deg_inv[deg == 0] = 0 matches `deg_inv[inf] = 0`.
    deg = adj.sum(axis=1)
    deg_inv = jnp.where(deg != 0.0, 1.0 / deg, 0.0)

    # --- layout plumbing: fold batch into the lane dim and pad to TPU tiles ---
    C = B * F
    base = _round_up(max(N, 8), 128)
    tile_n = min(tile_n, base)
    tile_k = min(tile_k, base)
    tile = max(tile_n, tile_k)
    n_pad = _round_up(max(N, 8), tile)
    c_pad = _round_up(max(C, 1), 128)          # lane-dense stores

    a_p = (jnp.zeros((n_pad, n_pad), jnp.bfloat16)
           .at[:N, :N].set(adj.astype(jnp.bfloat16)))
    dinv_p = jnp.zeros((n_pad, 1), jnp.float32).at[:N, 0].set(deg_inv)
    xf = jnp.transpose(x, (1, 0, 2)).reshape(N, C)
    cur = (jnp.zeros((n_pad, c_pad), jnp.bfloat16)
           .at[:N, :C].set(xf.astype(jnp.bfloat16)))

    # --- k diffusion steps: one pallas_call per step, output fed back as input.
    diffs = []
    for _ in range(n_steps):
        cur = _diffusion_step(a_p, cur, dinv_p, tile_n=tile_n, tile_k=tile_k)
        diffs.append(cur)

    # --- unfold the lane-folded bf16 outputs back to [B, N, F] f32 and concat -
    def unfold(m):                      # (n_pad, c_pad) bf16 -> (B, N, F) f32
        return jnp.transpose(
            m[:N, :C].astype(jnp.float32).reshape(N, B, F), (1, 0, 2))

    segs = [x] + [unfold(d) for d in diffs]
    if global_attr:
        mean = x.mean(axis=1, keepdims=True)               # tiny: wrapper-side
        segs.append(jnp.broadcast_to(mean, (B, N, F)))
    return jnp.concatenate(segs, axis=-1)


def _reference(x, edge_index, edge_weight, k, global_attr, add_self_loops):
    """Pure-JAX (non-Pallas) reference mirroring the PyTorch module."""
    x = x.astype(jnp.float32)
    B, N, F = x.shape
    w = (jnp.ones((edge_index.shape[1],), jnp.float32)
         if edge_weight is None else edge_weight.astype(jnp.float32))
    adj = jnp.zeros((N, N), jnp.float32).at[edge_index[1], edge_index[0]].set(w)
    if add_self_loops:
        idx = jnp.arange(N)
        adj = adj.at[idx, idx].set(1.0)
    deg = adj.sum(axis=1)
    inv = jnp.where(deg != 0.0, 1.0 / deg, 0.0)
    a_norm = inv[:, None] * adj
    res, h = [x], x
    for _ in range(k):
        h = jnp.einsum('ij,bjf->bif', a_norm, h)
        res.append(h)
    if global_attr:
        res.append(jnp.broadcast_to(x.mean(axis=1, keepdims=True), x.shape))
    return jnp.concatenate(res, axis=-1)


if __name__ == "__main__":
    key = jax.random.PRNGKey(0)
    kx, ke = jax.random.split(key)
    B, N, F, E = 2, 20, 12, 64
    x = jax.random.normal(kx, (B, N, F), dtype=jnp.float32)
    edge_index = jax.random.randint(ke, (2, E), 0, N, dtype=jnp.int32)
    edge_weight = None  # unweighted graph (implicit weights of 1.0)

    fwd = jax.jit(functools.partial(sgp_spatial_encoder,
                                    receptive_field=2, global_attr=True,
                                    add_self_loops=False))
    out = jax.block_until_ready(fwd(x, edge_index, edge_weight))

    ref = _reference(x, edge_index, edge_weight, k=2,
                     global_attr=True, add_self_loops=False)
    assert out.shape == ref.shape == (B, N, 4 * F), out.shape
    err = float(jnp.max(jnp.abs(out - ref)))
    assert err < 5e-2, f"max abs error vs reference: {err}"
    print("KERNEL_OK")
</pallas_src>

<mosaic_0001>
module attributes {stable_mosaic.version = 11 : i64} {
  func.func @_diffusion_step_kernel(%arg0: i32, %arg1: i32, %arg2: memref<128x128xbf16, #tpu.memory_space<vmem>>, %arg3: memref<128x128xbf16, #tpu.memory_space<vmem>>, %arg4: memref<128x1xf32, #tpu.memory_space<vmem>>, %arg5: memref<128x128xbf16, #tpu.memory_space<vmem>>, %arg6: memref<128x128xf32, #tpu.memory_space<vmem>>) attributes {dimension_semantics = [#tpu.dimension_semantics<parallel>, #tpu.dimension_semantics<arbitrary>], iteration_bounds = array<i64: 1, 1>, scalar_prefetch = 0 : i64, scratch_operands = 1 : i64, tpu.core_type = #tpu.core_type<tc>, window_params = [{transform_indices = @transform_0, window_bounds = array<i64: 128, 128>}, {transform_indices = @transform_1, window_bounds = array<i64: 128, 128>}, {transform_indices = @transform_2, window_bounds = array<i64: 128, 1>}, {transform_indices = @transform_3, window_bounds = array<i64: 128, 128>}]} {
    %c0_i32 = arith.constant 0 : i32
    %0 = arith.cmpi eq, %arg1, %c0_i32 : i32
    %1 = arith.extui %0 : i1 to i32
    %c0_i32_0 = arith.constant 0 : i32
    %2 = arith.cmpi ne, %1, %c0_i32_0 : i32
    scf.if %2 {
      %cst_10 = arith.constant 0.000000e+00 : f32
      %12 = vector.broadcast %cst_10 : f32 to vector<128x128xf32>
      %c0_11 = arith.constant 0 : index
      %c0_12 = arith.constant 0 : index
      %13 = vector.load %arg6[%c0_11, %c0_12] : memref<128x128xf32, #tpu.memory_space<vmem>>, vector<128x128xf32>
      tpu.vector_store %arg6[%c0_11, %c0_12], %12 {strides = array<i32>} : memref<128x128xf32, #tpu.memory_space<vmem>>, vector<128x128xf32>,
    } else {
    }
    %c0 = arith.constant 0 : index
    %c0_1 = arith.constant 0 : index
    %3 = vector.load %arg6[%c0, %c0_1] : memref<128x128xf32, #tpu.memory_space<vmem>>, vector<128x128xf32>
    %c0_2 = arith.constant 0 : index
    %c0_3 = arith.constant 0 : index
    %4 = vector.load %arg2[%c0_2, %c0_3] : memref<128x128xbf16, #tpu.memory_space<vmem>>, vector<128x128xbf16>
    %c0_4 = arith.constant 0 : index
    %c0_5 = arith.constant 0 : index
    %5 = vector.load %arg3[%c0_4, %c0_5] : memref<128x128xbf16, #tpu.memory_space<vmem>>, vector<128x128xbf16>
    %cst = arith.constant dense<0.000000e+00> : vector<128x128xf32>
    %6 = tpu.matmul %4, %5, %cst {dimension_numbers = #tpu.dot_dimension_numbers<[1], [0], [0], [1], [0, 0, 1, 1], [], []>} : vector<128x128xbf16>, vector<128x128xbf16>, vector<128x128xf32> -> vector<128x128xf32>
    %7 = arith.addf %3, %6 : vector<128x128xf32>
    %c0_6 = arith.constant 0 : index
    %c0_7 = arith.constant 0 : index
    %8 = vector.load %arg6[%c0_6, %c0_7] : memref<128x128xf32, #tpu.memory_space<vmem>>, vector<128x128xf32>
    tpu.vector_store %arg6[%c0_6, %c0_7], %7 {strides = array<i32>} : memref<128x128xf32, #tpu.memory_space<vmem>>, vector<128x128xf32>,
    %c0_i32_8 = arith.constant 0 : i32
    %9 = arith.cmpi eq, %arg1, %c0_i32_8 : i32
    %10 = arith.extui %9 : i1 to i32
    %c0_i32_9 = arith.constant 0 : i32
    %11 = arith.cmpi ne, %10, %c0_i32_9 : i32
    scf.if %11 {
      %c0_10 = arith.constant 0 : index
      %c0_11 = arith.constant 0 : index
      %12 = vector.load %arg4[%c0_10, %c0_11] : memref<128x1xf32, #tpu.memory_space<vmem>>, vector<128x1xf32>
      %c0_12 = arith.constant 0 : index
      %c0_13 = arith.constant 0 : index
      %13 = vector.load %arg6[%c0_12, %c0_13] : memref<128x128xf32, #tpu.memory_space<vmem>>, vector<128x128xf32>
      %14 = vector.broadcast %12 : vector<128x1xf32> to vector<128x128xf32>
      %15 = arith.mulf %14, %13 : vector<128x128xf32>
      %16 = arith.truncf %15 : vector<128x128xf32> to vector<128x128xbf16>
      %c0_14 = arith.constant 0 : index
      %c0_15 = arith.constant 0 : index
      %17 = vector.load %arg5[%c0_14, %c0_15] : memref<128x128xbf16, #tpu.memory_space<vmem>>, vector<128x128xbf16>
      tpu.vector_store %arg5[%c0_14, %c0_15], %16 {strides = array<i32>} : memref<128x128xbf16, #tpu.memory_space<vmem>>, vector<128x128xbf16>,
    } else {
    }
    return
  }
  func.func @transform_0(%arg0: i32, %arg1: i32) -> (i32, i32) {
    %c0_i32 = arith.constant 0 : i32
    return %arg0, %arg1 : i32, i32
  }
  func.func @transform_1(%arg0: i32, %arg1: i32) -> (i32, i32) {
    %c0_i32 = arith.constant 0 : i32
    %c0_i32_0 = arith.constant 0 : i32
    return %arg1, %c0_i32 : i32, i32
  }
  func.func @transform_2(%arg0: i32, %arg1: i32) -> (i32, i32) {
    %c0_i32 = arith.constant 0 : i32
    %c0_i32_0 = arith.constant 0 : i32
    return %arg0, %c0_i32 : i32, i32
  }
  func.func @transform_3(%arg0: i32, %arg1: i32) -> (i32, i32) {
    %c0_i32 = arith.constant 0 : i32
    %c0_i32_0 = arith.constant 0 : i32
    return %arg0, %c0_i32 : i32, i32
  }
}

</mosaic_0001>

<bundles_post_ra>
// kernel: sgp_spatial_encoder.2
= control target key start
LH: loop header
LB: loop body
LE: loop exit
PB: predicated region body
PF: predicated region fallthrough
CT: control target
= control target key end

     0   :  { %v581_v0 = vmov 0   ;;  %s722_s2 = inlined_call_operand.vmem [shape: f32[128,1], index: 2, kind: input, shape index: {}]   ;;  %s723_s1 = inlined_call_operand.vmem [shape: bf16[128,128], index: 1, kind: input, shape index: {}]   ;;  %s724_s0 = inlined_call_operand.vmem [shape: bf16[128,128], index: 0, kind: input, shape index: {}]   ;;  %s725_s3 = inlined_call_operand.vmem [shape: bf16[128,128], index: 3, kind: output, shape index: {}]  }
   0x1   :  { %578 = vset.pattern.permute.xlu0 %v581_v0  ;;  %v262_v1 = vld [vmem:[%s722_s2] sm:$0xff]  ;;  %v505_v2 = vld [vmem:[%s723_s1 + $0x38] sm:$0xff]  ;;  %579 = vset.pattern.permute.xlu1 %v581_v0  ;;  %v264_v3 = vld [vmem:[%s722_s2 + $0x10] sm:$0xff] }
   0x2   :  { %296 = vperm.xlu0 %578, %v262_v1   ;;  %580 = vset.pattern.permute.xlu2 %v581_v0  ;;  %v504_v4 = vld [vmem:[%s723_s1 + $0x30] sm:$0xff]  ;;  %v263_v5 = vld [vmem:[%s722_s2 + $0x8] sm:$0xff]  ;;  %v266_v7 = vld [vmem:[%s722_s2 + $0x20] sm:$0xff] }
   0x3   :  { %178 = vmatpush.bf16.msra.mxu0 %v505_v2  ;;  %553 = vmatpush.bf16.msra.mxu1 %v505_v2  ;;  %v503_v6 = vld [vmem:[%s723_s1 + $0x28] sm:$0xff]  ;;  %v265_v8 = vld [vmem:[%s722_s2 + $0x18] sm:$0xff]  ;;  %v502_v9 = vld [vmem:[%s723_s1 + $0x20] sm:$0xff] }
   0x4   :  { %554 = vmatpush.bf16.msra.mxu2 %v505_v2  ;;  %555 = vmatpush.bf16.msra.mxu3 %v505_v2  ;;  %v267_v10 = vld [vmem:[%s722_s2 + $0x28] sm:$0xff]  ;;  %v268_v11 = vld [vmem:[%s722_s2 + $0x30] sm:$0xff]  ;;  %v501_v12 = vld [vmem:[%s723_s1 + $0x18] sm:$0xff] }
   0x5   :  { %306 = vperm.xlu1 %579, %v264_v3   ;;  %316 = vperm.xlu2 %580, %v266_v7   ;;  %v269_v13 = vld [vmem:[%s722_s2 + $0x38] sm:$0xff]  ;;  %v500_v14 = vld [vmem:[%s723_s1 + $0x10] sm:$0xff]  ;;  %v270_v15 = vld [vmem:[%s722_s2 + $0x40] sm:$0xff] }
   0x6   :  { %v271_v16 = vld [vmem:[%s722_s2 + $0x48] sm:$0xff]  ;;  %v272_v18 = vld [vmem:[%s722_s2 + $0x50] sm:$0xff]  ;;  %v498_v19 = vld [vmem:[%s723_s1] sm:$0xff] }
   0x7   :  { %179 = vmatpush.bf16.msra.mxu0 %v504_v4  ;;  %556 = vmatpush.bf16.msra.mxu1 %v504_v4  ;;  %v499_v17 = vld [vmem:[%s723_s1 + $0x8] sm:$0xff]  ;;  %v490_v20 = vld [vmem:[%s724_s0] sm:$0xff]  ;;  %v273_v21 = vld [vmem:[%s722_s2 + $0x58] sm:$0xff] }
   0x8   :  { %557 = vmatpush.bf16.msra.mxu2 %v504_v4  ;;  %558 = vmatpush.bf16.msra.mxu3 %v504_v4  ;;  %v274_v22 = vld [vmem:[%s722_s2 + $0x60] sm:$0xff]  ;;  %v492_v23 = vld [vmem:[%s724_s0 + $0x10] sm:$0xff]  ;;  %v275_v26 = vld [vmem:[%s722_s2 + $0x68] sm:$0xff] }
   0x9   :  { %v494_v24 = vld [vmem:[%s724_s0 + $0x20] sm:$0xff]  ;;  %v496_v25 = vld [vmem:[%s724_s0 + $0x30] sm:$0xff]  ;;  %v277_v28 = vld [vmem:[%s722_s2 + $0x78] sm:$0xff] }
   0xa   :  { %301 = vperm.xlu0 %578, %v263_v5   ;;  %v276_v27 = vld [vmem:[%s722_s2 + $0x70] sm:$0xff]  ;;  %v491_v29 = vld [vmem:[%s724_s0 + $0x8] sm:$0xff]  ;;  %v493_v30 = vld [vmem:[%s724_s0 + $0x18] sm:$0xff] }
   0xb   :  { %180 = vmatpush.bf16.msra.mxu0 %v503_v6  ;;  %559 = vmatpush.bf16.msra.mxu1 %v503_v6  ;;  %v495_v31 = vld [vmem:[%s724_s0 + $0x28] sm:$0xff]  ;;  %v497_v32 = vld [vmem:[%s724_s0 + $0x38] sm:$0xff] }
   0xc   :  { %560 = vmatpush.bf16.msra.mxu2 %v503_v6  ;;  %561 = vmatpush.bf16.msra.mxu3 %v503_v6 }
   0xd   :  { %311 = vperm.xlu1 %579, %v265_v8   ;;  %321 = vperm.xlu2 %580, %v267_v10  }
   0xf   :  { %181 = vmatpush.bf16.msra.mxu0 %v502_v9  ;;  %562 = vmatpush.bf16.msra.mxu1 %v502_v9 }
  0x10   :  { %563 = vmatpush.bf16.msra.mxu2 %v502_v9  ;;  %564 = vmatpush.bf16.msra.mxu3 %v502_v9 }
  0x12   :  { %326 = vperm.xlu0 %578, %v268_v11  }
  0x13   :  { %182 = vmatpush.bf16.msra.mxu0 %v501_v12  ;;  %565 = vmatpush.bf16.msra.mxu1 %v501_v12 }
  0x14   :  { %566 = vmatpush.bf16.msra.mxu2 %v501_v12  ;;  %567 = vmatpush.bf16.msra.mxu3 %v501_v12 }
  0x15   :  { %331 = vperm.xlu1 %579, %v269_v13   ;;  %336 = vperm.xlu2 %580, %v270_v15  }
  0x17   :  { %183 = vmatpush.bf16.msra.mxu0 %v500_v14  ;;  %568 = vmatpush.bf16.msra.mxu1 %v500_v14 }
  0x18   :  { %569 = vmatpush.bf16.msra.mxu2 %v500_v14  ;;  %570 = vmatpush.bf16.msra.mxu3 %v500_v14 }
  0x1a   :  { %341 = vperm.xlu0 %578, %v271_v16  }
  0x1b   :  { %184 = vmatpush.bf16.msra.mxu0 %v499_v17  ;;  %571 = vmatpush.bf16.msra.mxu1 %v499_v17 }
  0x1c   :  { %572 = vmatpush.bf16.msra.mxu2 %v499_v17  ;;  %573 = vmatpush.bf16.msra.mxu3 %v499_v17 }
  0x1d   :  { %346 = vperm.xlu1 %579, %v272_v18   ;;  %351 = vperm.xlu2 %580, %v273_v21  }
  0x1f   :  { %185 = vmatpush.bf16.msra.mxu0 %v498_v19  ;;  %574 = vmatpush.bf16.msra.mxu1 %v498_v19 }
  0x20   :  { %575 = vmatpush.bf16.msra.mxu2 %v498_v19  ;;  %576 = vmatpush.bf16.msra.mxu3 %v498_v19 }
  0x22   :  { %356 = vperm.xlu0 %578, %v274_v22   ;;  %186 = vmatmul.bf16.vlgmr.msra.gmra.mxu0 %v490_v20 }
  0x23   :  { %196 = vmatmul.bf16.vlgmr.msra.gmra.mxu1 %v492_v23  ;;  %206 = vmatmul.bf16.vlgmr.msra.gmra.mxu2 %v494_v24 }
  0x24   :  { %216 = vmatmul.bf16.vlgmr.msra.gmra.mxu3 %v496_v25 }
  0x25   :  { %361 = vperm.xlu1 %579, %v275_v26   ;;  %366 = vperm.xlu2 %580, %v276_v27  }
  0x2a   :  { %371 = vperm.xlu0 %578, %v277_v28  }
  0x32   :  { %191 = vmatmul.bf16.gmra.mxu0 %v491_v29 }
  0x33   :  { %201 = vmatmul.bf16.gmra.mxu1 %v493_v30  ;;  %211 = vmatmul.bf16.gmra.mxu2 %v495_v31 }
  0x34   :  { %221 = vmatmul.bf16.gmra.mxu3 %v497_v32 }
  0x5f   :  { %v317_v37 = vpop.permute.xlu2 %316 }
  0x67   :  { %v322_v41 = vpop.permute.xlu2 %321 }
  0x6f   :  { %v337_v53 = vpop.permute.xlu2 %336 }
  0x74   :  { %v297_v33 = vpop.permute.xlu0 %296 }
  0x77   :  { %v307_v34 = vpop.permute.xlu1 %306  ;;  %v352_v4 = vpop.permute.xlu2 %351 }
  0x7c   :  { %v302_v35 = vpop.permute.xlu0 %301 }
  0x7f   :  { %v312_v36 = vpop.permute.xlu1 %311  ;;  %v367_v15 = vpop.permute.xlu2 %366 }
  0x84   :  { %v327_v38 = vpop.permute.xlu0 %326 }
  0x87   :  { %v332_v39 = vpop.permute.xlu1 %331 }
  0x8c   :  { %v342_v43 = vpop.permute.xlu0 %341 }
  0x8f   :  { %v347_v44 = vpop.permute.xlu1 %346 }
  0x94   :  { %v357_v56 = vpop.permute.xlu0 %356 }
  0x97   :  { %v362_v57 = vpop.permute.xlu1 %361 }
  0x9c   :  { %v372_v17 = vpop.permute.xlu0 %371 }
  0x9f   :  { %v187_v40 = vpop.f32.mrf.mxu0 }
  0xa0   :  { %v197_v42 = vpop.f32.mrf.mxu1  ;;  %v374_v48 = vmul.f32 %v297_v33, %v187_v40 }
  0xa1   :  { %v378_v51 = vmul.f32 %v317_v37, %v197_v42 }
  0xa6   :  { %v207_v45 = vpop.f32.mrf.mxu2 }
  0xa7   :  { %v217_v46 = vpop.f32.mrf.mxu3  ;;  %v189_v47 = vpop.f32.mrf.mxu0  ;;  %v382_v59 = vmul.f32 %v337_v53, %v207_v45 }
  0xa8   :  { %v375_v49 = vmul.f32 %v302_v35, %v189_v47  ;;  %v199_v50 = vpop.f32.mrf.mxu1  ;;  %v386_v63 = vmul.f32 %v357_v56, %v217_v46 }
  0xa9   :  { %v379_v52 = vmul.f32 %v322_v41, %v199_v50 }
  0xaa   :  { %v509_v54 = vpack.c.bf16 %v375_v49, %v374_v48 }
  0xab   :  { %v519_v55 = vpack.c.bf16 %v379_v52, %v378_v51 }
  0xac   :  { %510 = vst [vmem:[%s725_s3] sm:$0xff] %v509_v54  }
  0xad   :  { %547 = vst [vmem:[%s725_s3 + $0x10] sm:$0xff] %v519_v55  }
  0xae   :  { %v209_v58 = vpop.f32.mrf.mxu2 }
  0xaf   :  { %v383_v60 = vmul.f32 %v342_v43, %v209_v58  ;;  %v219_v61 = vpop.f32.mrf.mxu3  ;;  %v192_v62 = vpop.f32.mrf.mxu0 }
  0xb0   :  { %v387_v0 = vmul.f32 %v362_v57, %v219_v61  ;;  %v202_v1 = vpop.f32.mrf.mxu1  ;;  %v376_v8 = vmul.f32 %v307_v34, %v192_v62 }
  0xb1   :  { %v529_v2 = vpack.c.bf16 %v383_v60, %v382_v59  ;;  %v380_v11 = vmul.f32 %v327_v38, %v202_v1 }
  0xb2   :  { %v539_v3 = vpack.c.bf16 %v387_v0, %v386_v63 }
  0xb3   :  { %549 = vst [vmem:[%s725_s3 + $0x20] sm:$0xff] %v529_v2  }
  0xb4   :  { %551 = vst [vmem:[%s725_s3 + $0x30] sm:$0xff] %v539_v3  }
  0xb6   :  { %v212_v5 = vpop.f32.mrf.mxu2 }
  0xb7   :  { %v222_v6 = vpop.f32.mrf.mxu3  ;;  %v194_v7 = vpop.f32.mrf.mxu0  ;;  %v384_v18 = vmul.f32 %v347_v44, %v212_v5 }
  0xb8   :  { %v377_v9 = vmul.f32 %v312_v36, %v194_v7  ;;  %v204_v10 = vpop.f32.mrf.mxu1  ;;  %v388_v21 = vmul.f32 %v367_v15, %v222_v6 }
  0xb9   :  { %v381_v12 = vmul.f32 %v332_v39, %v204_v10 }
  0xba   :  { %v514_v13 = vpack.c.bf16 %v377_v9, %v376_v8 }
  0xbb   :  { %v524_v14 = vpack.c.bf16 %v381_v12, %v380_v11 }
  0xbc   :  { %546 = vst [vmem:[%s725_s3 + $0x8] sm:$0xff] %v514_v13  }
  0xbd   :  { %548 = vst [vmem:[%s725_s3 + $0x18] sm:$0xff] %v524_v14  }
  0xbe   :  { %v214_v16 = vpop.f32.mrf.mxu2 }
  0xbf   :  { %v385_v19 = vmul.f32 %v352_v4, %v214_v16  ;;  %v224_v20 = vpop.f32.mrf.mxu3 }
  0xc0   :  { %v389_v22 = vmul.f32 %v372_v17, %v224_v20 }
  0xc1   :  { %v534_v23 = vpack.c.bf16 %v385_v19, %v384_v18 }
  0xc2   :  { %v544_v24 = vpack.c.bf16 %v389_v22, %v388_v21 }
  0xc3   :  { %550 = vst [vmem:[%s725_s3 + $0x28] sm:$0xff] %v534_v23  }
  0xc4   :  { %552 = vst [vmem:[%s725_s3 + $0x38] sm:$0xff] %v544_v24  }

</bundles_post_ra>
